<compile_context>
chip_gen: v7x
topology: tpu7x:2x2x1
jax: 0.10.0
libtpu: 0.0.40
codegen_flags: <defaults>
</compile_context>

<pallas_src>
import jax
import jax.numpy as jnp
from jax.experimental import pallas as pl
from jax.experimental.pallas import tpu as pltpu

INPUT_SIZE = 28
HIDDEN = (56, 56)
BN_EPS = 1e-5


def _round_up(n, m):
    return ((n + m - 1) // m) * m


def _credit_kernel(x_ref, w1_ref, b1_ref, w2_ref, b2_ref, w3_ref, b3_ref, o_ref):
    """Batch-on-lanes: x_ref is (28, TB); activations are (F, TB); output is (1, TB)."""
    cdt = w2_ref.dtype                      # MXU operand dtype (f32, or bf16 if use_bf16)

    # ---- Linear 1 (+ folded BatchNorm) + ReLU; Dropout = identity in eval ----
    h = jnp.dot(w1_ref[...], x_ref[...], preferred_element_type=jnp.float32)
    h = jnp.maximum(h + b1_ref[...], 0.0)                       # (56, TB) f32
    # TODO(synk): train-mode Dropout (pltpu.prng_* Bernoulli mask / (1-p)) not implemented;
    # eval-mode identity is used, consistent with BN running-stats inference semantics.

    # ---- Linear 2 (+ folded BatchNorm) + ReLU ----
    h = jnp.dot(w2_ref[...], h.astype(cdt), preferred_element_type=jnp.float32)
    h = jnp.maximum(h + b2_ref[...], 0.0)                       # (56, TB) f32

    # ---- Linear 3 + Sigmoid (naturally lane-dense (1, TB) result) ----
    logit = jnp.dot(w3_ref[...], h.astype(cdt), preferred_element_type=jnp.float32)
    o_ref[...] = jax.nn.sigmoid(logit + b3_ref[...])            # (1, TB) f32


def _fold_bn(w, b, gamma, beta, mean, var, eps=BN_EPS):
    """Fold eval-mode BatchNorm into the preceding Linear.
    w: (out, in), b/gamma/beta/mean/var: (out,). Returns W' (out,in), b' (out,1)."""
    s = gamma * jax.lax.rsqrt(var + eps)
    w_f = w * s[:, None]
    b_f = ((b - mean) * s + beta)[:, None]
    return w_f, b_f


def credit_forward(x, params, *, block_b=2048, use_bf16=False):
    """x: (B, 1, 28) float32, matching the PyTorch module's pre-squeeze input."""
    assert x.ndim == 3 and x.shape[1] == 1, "expected input of shape (B, 1, 28)"
    assert x.shape[-1] == INPUT_SIZE
    B = x.shape[0]
    x2d = x[:, 0, :]                                            # squeeze(1) -> (B, 28)

    # Fold BatchNorm into the Linear layers (numerically identical in eval mode).
    w1f, b1f = _fold_bn(params["w1"], params["b1"], params["g1"], params["be1"],
                        params["m1"], params["v1"])
    w2f, b2f = _fold_bn(params["w2"], params["b2"], params["g2"], params["be2"],
                        params["m2"], params["v2"])
    w3f = params["w3"]                                          # (1, 56)
    b3f = params["b3"].reshape(1, 1)                            # (1, 1)

    # Batch tile: multiple of 128 (lane width); pad the batch to a whole number of tiles.
    tb = min(block_b, _round_up(B, 128))
    bp = _round_up(B, tb)
    if bp != B:
        x2d = jnp.pad(x2d, ((0, bp - B), (0, 0)))
    xT = x2d.T                                                  # (28, Bp): batch on lanes

    if use_bf16:  # halves HBM bytes on bf16-native MXUs (v6e/v7x); accumulate in f32
        xT = xT.astype(jnp.bfloat16)
        w1f, w2f, w3f = (w.astype(jnp.bfloat16) for w in (w1f, w2f, w3f))

    h0, h1 = HIDDEN
    const2d = lambda i: (0, 0)
    out = pl.pallas_call(
        _credit_kernel,
        out_shape=jax.ShapeDtypeStruct((1, bp), jnp.float32),
        grid=(bp // tb,),
        in_specs=[
            pl.BlockSpec((INPUT_SIZE, tb), lambda i: (0, i)),   # x^T, tiled along lanes
            pl.BlockSpec((h0, INPUT_SIZE), const2d),            # weights/biases: resident,
            pl.BlockSpec((h0, 1), const2d),                     # DMA'd once per call
            pl.BlockSpec((h1, h0), const2d),
            pl.BlockSpec((h1, 1), const2d),
            pl.BlockSpec((1, h1), const2d),
            pl.BlockSpec((1, 1), const2d),
        ],
        out_specs=pl.BlockSpec((1, tb), lambda i: (0, i)),      # lane-dense output row
        compiler_params=pltpu.CompilerParams(
            dimension_semantics=("parallel",)),
    )(xT, w1f, b1f, w2f, b2f, w3f, b3f)

    return out[0, :B].reshape(B, 1)


def init_params(key):
    """Deterministic init mirroring the PyTorch module:
       kaiming_normal_(weight, nonlinearity='relu') -> std = sqrt(2/fan_in), bias = 0;
       BatchNorm gamma=1, beta=0, running_mean=0, running_var=1.  Weights are (out, in)."""
    k1, k2, k3 = jax.random.split(key, 3)

    def kaiming(k, fan_out, fan_in):
        std = (2.0 / fan_in) ** 0.5
        return jax.random.normal(k, (fan_out, fan_in), jnp.float32) * std

    h0, h1 = HIDDEN
    return {
        "w1": kaiming(k1, h0, INPUT_SIZE), "b1": jnp.zeros((h0,), jnp.float32),
        "g1": jnp.ones((h0,), jnp.float32), "be1": jnp.zeros((h0,), jnp.float32),
        "m1": jnp.zeros((h0,), jnp.float32), "v1": jnp.ones((h0,), jnp.float32),

        "w2": kaiming(k2, h1, h0), "b2": jnp.zeros((h1,), jnp.float32),
        "g2": jnp.ones((h1,), jnp.float32), "be2": jnp.zeros((h1,), jnp.float32),
        "m2": jnp.zeros((h1,), jnp.float32), "v2": jnp.ones((h1,), jnp.float32),

        "w3": kaiming(k3, 1, h1), "b3": jnp.zeros((1,), jnp.float32),
    }


def _reference_forward(x, params):
    """Pure-JAX reference of the same eval-mode forward (unfused BN), for sanity check."""
    h = x[:, 0, :]
    h = h @ params["w1"].T + params["b1"]
    h = (h - params["m1"]) / jnp.sqrt(params["v1"] + BN_EPS) * params["g1"] + params["be1"]
    h = jnp.maximum(h, 0.0)
    h = h @ params["w2"].T + params["b2"]
    h = (h - params["m2"]) / jnp.sqrt(params["v2"] + BN_EPS) * params["g2"] + params["be2"]
    h = jnp.maximum(h, 0.0)
    return jax.nn.sigmoid(h @ params["w3"].T + params["b3"])


if __name__ == "__main__":
    key = jax.random.PRNGKey(0)
    pkey, xkey = jax.random.split(key)
    params = init_params(pkey)

    B = 8
    x = jax.random.normal(xkey, (B, 1, INPUT_SIZE), jnp.float32)

    out = jax.block_until_ready(credit_forward(x, params))
    ref = _reference_forward(x, params)

    assert out.shape == (B, 1)
    assert jnp.allclose(out, ref, atol=1e-5, rtol=1e-5)
    print("KERNEL_OK")
</pallas_src>

<mosaic_0001>
module attributes {stable_mosaic.version = 11 : i64} {
  func.func @_credit_kernel(%arg0: i32, %arg1: memref<28x128xf32, #tpu.memory_space<vmem>>, %arg2: memref<56x28xf32, #tpu.memory_space<vmem>>, %arg3: memref<56x1xf32, #tpu.memory_space<vmem>>, %arg4: memref<56x56xf32, #tpu.memory_space<vmem>>, %arg5: memref<56x1xf32, #tpu.memory_space<vmem>>, %arg6: memref<1x56xf32, #tpu.memory_space<vmem>>, %arg7: memref<1x1xf32, #tpu.memory_space<vmem>>, %arg8: memref<1x128xf32, #tpu.memory_space<vmem>>) attributes {dimension_semantics = [#tpu.dimension_semantics<parallel>], iteration_bounds = array<i64: 1>, scalar_prefetch = 0 : i64, scratch_operands = 0 : i64, tpu.core_type = #tpu.core_type<tc>, window_params = [{transform_indices = @transform_0, window_bounds = array<i64: 28, 128>}, {pipeline_mode = #tpu.pipeline_mode<synchronous>, transform_indices = @transform_1, window_bounds = array<i64: 56, 28>}, {pipeline_mode = #tpu.pipeline_mode<synchronous>, transform_indices = @transform_2, window_bounds = array<i64: 56, 1>}, {pipeline_mode = #tpu.pipeline_mode<synchronous>, transform_indices = @transform_3, window_bounds = array<i64: 56, 56>}, {pipeline_mode = #tpu.pipeline_mode<synchronous>, transform_indices = @transform_4, window_bounds = array<i64: 56, 1>}, {pipeline_mode = #tpu.pipeline_mode<synchronous>, transform_indices = @transform_5, window_bounds = array<i64: 1, 56>}, {pipeline_mode = #tpu.pipeline_mode<synchronous>, transform_indices = @transform_6, window_bounds = array<i64: 1, 1>}, {transform_indices = @transform_7, window_bounds = array<i64: 1, 128>}]} {
    %c0 = arith.constant 0 : index
    %c0_0 = arith.constant 0 : index
    %0 = vector.load %arg2[%c0, %c0_0] : memref<56x28xf32, #tpu.memory_space<vmem>>, vector<56x28xf32>
    %c0_1 = arith.constant 0 : index
    %c0_2 = arith.constant 0 : index
    %1 = vector.load %arg1[%c0_1, %c0_2] : memref<28x128xf32, #tpu.memory_space<vmem>>, vector<28x128xf32>
    %cst = arith.constant dense<0.000000e+00> : vector<56x128xf32>
    %2 = tpu.matmul %0, %1, %cst {dimension_numbers = #tpu.dot_dimension_numbers<[1], [0], [0], [1], [0, 0, 1, 1], [], []>} : vector<56x28xf32>, vector<28x128xf32>, vector<56x128xf32> -> vector<56x128xf32>
    %c0_3 = arith.constant 0 : index
    %c0_4 = arith.constant 0 : index
    %3 = vector.load %arg3[%c0_3, %c0_4] : memref<56x1xf32, #tpu.memory_space<vmem>>, vector<56x1xf32>
    %4 = vector.broadcast %3 : vector<56x1xf32> to vector<56x128xf32>
    %5 = arith.addf %2, %4 : vector<56x128xf32>
    %cst_5 = arith.constant 0.000000e+00 : f32
    %6 = vector.broadcast %cst_5 : f32 to vector<56x128xf32>
    %7 = arith.maximumf %5, %6 : vector<56x128xf32>
    %c0_6 = arith.constant 0 : index
    %c0_7 = arith.constant 0 : index
    %8 = vector.load %arg4[%c0_6, %c0_7] : memref<56x56xf32, #tpu.memory_space<vmem>>, vector<56x56xf32>
    %cst_8 = arith.constant dense<0.000000e+00> : vector<56x128xf32>
    %9 = tpu.matmul %8, %7, %cst_8 {dimension_numbers = #tpu.dot_dimension_numbers<[1], [0], [0], [1], [0, 0, 1, 1], [], []>} : vector<56x56xf32>, vector<56x128xf32>, vector<56x128xf32> -> vector<56x128xf32>
    %c0_9 = arith.constant 0 : index
    %c0_10 = arith.constant 0 : index
    %10 = vector.load %arg5[%c0_9, %c0_10] : memref<56x1xf32, #tpu.memory_space<vmem>>, vector<56x1xf32>
    %11 = vector.broadcast %10 : vector<56x1xf32> to vector<56x128xf32>
    %12 = arith.addf %9, %11 : vector<56x128xf32>
    %cst_11 = arith.constant 0.000000e+00 : f32
    %13 = vector.broadcast %cst_11 : f32 to vector<56x128xf32>
    %14 = arith.maximumf %12, %13 : vector<56x128xf32>
    %c0_12 = arith.constant 0 : index
    %c0_13 = arith.constant 0 : index
    %15 = vector.load %arg6[%c0_12, %c0_13] : memref<1x56xf32, #tpu.memory_space<vmem>>, vector<1x56xf32>
    %cst_14 = arith.constant dense<0.000000e+00> : vector<1x128xf32>
    %16 = tpu.matmul %15, %14, %cst_14 {dimension_numbers = #tpu.dot_dimension_numbers<[1], [0], [0], [1], [0, 0, 1, 1], [], []>} : vector<1x56xf32>, vector<56x128xf32>, vector<1x128xf32> -> vector<1x128xf32>
    %c0_15 = arith.constant 0 : index
    %c0_16 = arith.constant 0 : index
    %17 = vector.load %arg7[%c0_15, %c0_16] : memref<1x1xf32, #tpu.memory_space<vmem>>, vector<1x1xf32>
    %18 = vector.broadcast %17 : vector<1x1xf32> to vector<1x128xf32>
    %19 = arith.addf %16, %18 : vector<1x128xf32>
    %20 = arith.negf %19 : vector<1x128xf32>
    %21 = math.exp %20 : vector<1x128xf32>
    %cst_17 = arith.constant 1.000000e+00 : f32
    %22 = vector.broadcast %cst_17 : f32 to vector<1x128xf32>
    %23 = arith.addf %22, %21 : vector<1x128xf32>
    %24 = arith.divf %22, %23 : vector<1x128xf32>
    %c0_18 = arith.constant 0 : index
    %c0_19 = arith.constant 0 : index
    %25 = vector.load %arg8[%c0_18, %c0_19] : memref<1x128xf32, #tpu.memory_space<vmem>>, vector<1x128xf32>
    tpu.vector_store %arg8[%c0_18, %c0_19], %24 {strides = array<i32>} : memref<1x128xf32, #tpu.memory_space<vmem>>, vector<1x128xf32>,
    return
  }
  func.func @transform_0(%arg0: i32) -> (i32, i32) {
    %c0_i32 = arith.constant 0 : i32
    %c0_i32_0 = arith.constant 0 : i32
    return %c0_i32, %arg0 : i32, i32
  }
  func.func @transform_1(%arg0: i32) -> (i32, i32) {
    %c0_i32 = arith.constant 0 : i32
    %c0_i32_0 = arith.constant 0 : i32
    %c0_i32_1 = arith.constant 0 : i32
    return %c0_i32, %c0_i32_0 : i32, i32
  }
  func.func @transform_2(%arg0: i32) -> (i32, i32) {
    %c0_i32 = arith.constant 0 : i32
    %c0_i32_0 = arith.constant 0 : i32
    %c0_i32_1 = arith.constant 0 : i32
    return %c0_i32, %c0_i32_0 : i32, i32
  }
  func.func @transform_3(%arg0: i32) -> (i32, i32) {
    %c0_i32 = arith.constant 0 : i32
    %c0_i32_0 = arith.constant 0 : i32
    %c0_i32_1 = arith.constant 0 : i32
    return %c0_i32, %c0_i32_0 : i32, i32
  }
  func.func @transform_4(%arg0: i32) -> (i32, i32) {
    %c0_i32 = arith.constant 0 : i32
    %c0_i32_0 = arith.constant 0 : i32
    %c0_i32_1 = arith.constant 0 : i32
    return %c0_i32, %c0_i32_0 : i32, i32
  }
  func.func @transform_5(%arg0: i32) -> (i32, i32) {
    %c0_i32 = arith.constant 0 : i32
    %c0_i32_0 = arith.constant 0 : i32
    %c0_i32_1 = arith.constant 0 : i32
    return %c0_i32, %c0_i32_0 : i32, i32
  }
  func.func @transform_6(%arg0: i32) -> (i32, i32) {
    %c0_i32 = arith.constant 0 : i32
    %c0_i32_0 = arith.constant 0 : i32
    %c0_i32_1 = arith.constant 0 : i32
    return %c0_i32, %c0_i32_0 : i32, i32
  }
  func.func @transform_7(%arg0: i32) -> (i32, i32) {
    %c0_i32 = arith.constant 0 : i32
    %c0_i32_0 = arith.constant 0 : i32
    return %c0_i32, %arg0 : i32, i32
  }
}

</mosaic_0001>

<bundles_post_ra>
// kernel: tpu_custom_call.1
= control target key start
LH: loop header
LB: loop body
LE: loop exit
PB: predicated region body
PF: predicated region fallthrough
CT: control target
= control target key end

     0   :  { %s906_s0 = inlined_call_operand.vmem [shape: f32[28,128], index: 0, kind: input, shape index: {}]   ;;  %s907_s1 = inlined_call_operand.vmem [shape: f32[56,28], index: 1, kind: input, shape index: {}]   ;;  %s908_s2 = inlined_call_operand.vmem [shape: f32[56,1], index: 2, kind: input, shape index: {}]   ;;  %s909_s3 = inlined_call_operand.vmem [shape: f32[56,56], index: 3, kind: input, shape index: {}]   ;;  %s910_s4 = inlined_call_operand.vmem [shape: f32[56,1], index: 4, kind: input, shape index: {}]   ;;  %s911_s5 = inlined_call_operand.vmem [shape: f32[1,56], index: 5, kind: input, shape index: {}]   ;;  %s912_s6 = inlined_call_operand.<no memory space> [shape: f32[1,1], index: 6, kind: input, shape index: {}]   ;;  %s913_s7 = inlined_call_operand.hbm [shape: f32[1,128], index: 7, kind: output, shape index: {}]  }
   0x1   :  { %v12_v0 = vstv %s912_s6 }
   0x2   :  { %13 = vst [vmem:[#allocation2] sm:$0x1] %v12_v0 }
   0x3   :  { %v36_v1 = vld [vmem:[%s906_s0] sm:$0xff]  ;;  %v37_v2 = vld [vmem:[%s906_s0 + $0x8] sm:$0xff]  ;;  %v38_v3 = vld [vmem:[%s906_s0 + $0x10] sm:$0xff]  ;;  %vm104_vm0 = vcmask 1043456   ;;  %v690_v4 = vmov 0.0|0.0   ;;  %vm691_vm1 = vmmov 0  }
   0x4   :  { %629 = vmatprep.subr.bf16.mxu0 %v690_v4  ;;  %v630_v5 = vpack.c.bf16 %v37_v2, %v36_v1  ;;  %v39_v6 = vld [vmem:[%s906_s0 + $0x18] sm:$0xf]  ;;  %636 = vmatprep.subr.bf16.mxu1 %v690_v4  ;;  %v692_v7 = vmov 0.0   ;;  %v693_v9 = vmov 0   ;;  %vm694_vm2 = vmmov 1   ;;  %v40_v10 = vld [vmem:[%s908_s2] sm:$0xff] }
   0x5   :  { %556 = vmatprep.mubr.msk.f32.mxu0 %vm691_vm1, %v692_v7  ;;  %591 = vmatprep.mubr.msk.f32.mxu1 %vm691_vm1, %v692_v7  ;;  %v633_v8 = vpack.c.bf16 %v39_v6, %v38_v3  ;;  %vm634_vm3 = vmpackc.low %vm104_vm0, %vm694_vm2  ;;  %v42_v11 = vld [vmem:[%s908_s2 + $0x10] sm:$0xff]  ;;  %v41_v12 = vld [vmem:[%s908_s2 + $0x8] sm:$0xff]  ;;  %vm82_vm4 = vcmask 228352  }
   0x6   :  { %631 = vmatpush3.bf16.msra.mxu0 %v630_v5  ;;  %660 = vset.pattern.permute.xlu0 %v693_v9  ;;  %v43_v13 = vld [vmem:[%s908_s2 + $0x18] sm:$0xff]  ;;  %v29_v14 = vld [vmem:[%s907_s1] sm:$0xff] }
   0x7   :  { %632 = vmatprep.subr.bf16.mxu0 %v690_v4  ;;  %661 = vset.pattern.permute.xlu1 %v693_v9 }
   0x8   :  { %49 = vperm.xlu0 %660, %v40_v10   ;;  %59 = vperm.xlu1 %661, %v42_v11  }
   0xa   :  { %635 = vmatpush3.bf16.msk.msra.mxu0 %vm634_vm3, %v633_v8 }
   0xb   :  { %645 = vmatprep.subr.bf16.mxu0 %v690_v4 }
   0xc   :  { %54 = vperm.xlu0 %660, %v41_v12   ;;  %64 = vperm.xlu1 %661, %v43_v13  }
   0xd   :  { %14 = vsyncpa [#allocation4], 0  ;;  %557 = vmatmul.mubr.msk.f32.vlgmr.msra.gmra.mrb[0].mxu0 %vm82_vm4, %v29_v14  ;;  %v44_v15 = vld [vmem:[%s908_s2 + $0x20] sm:$0xff]  ;;  %v45_v16 = vld [vmem:[%s908_s2 + $0x28] sm:$0xff]  ;;  %vm264_vm5 = vcmask 457728   ;;  %s695_s12 = smov [#allocation3]  }
   0xe   :  { %559 = vmatprep.mubr.msk.f32.mxu0 %vm691_vm1, %v692_v7  ;;  %v30_v17 = vld [vmem:[%s907_s1 + $0x8] sm:$0xff]  ;;  %v46_v18 = vld [vmem:[%s908_s2 + $0x30] sm:$0xff]  ;;  %v222_v19 = vld [vmem:[%s910_s4] sm:$0xff]  ;;  %s490_s13 = sshll.u32 %s695_s12, 4  ;;  %s491_s13 = int_to_ptr.vmem [resolvable:$true] %s490_s13 }
   0xf   :  { %v31_v20 = vld [vmem:[%s907_s1 + $0x10] sm:$0xff]  ;;  %v223_v21 = vld [vmem:[%s910_s4 + $0x8] sm:$0xff]  ;;  %v32_v23 = vld [vmem:[%s907_s1 + $0x18] sm:$0xff]  ;;  %s670_s14 = scalar_lea.vmem %s491_s13, 32  ;;  %p671_p1 = scmp.lt.s32.totalorder %s491_s13, %s491_s13 }
  0x10   :  { %69 = vperm.xlu0 %660, %v44_v15   ;;  %74 = vperm.xlu1 %661, %v45_v16   ;;  %v224_v22 = vld [vmem:[%s910_s4 + $0x10] sm:$0xff]  ;;  %v225_v24 = vld [vmem:[%s910_s4 + $0x18] sm:$0xff]  ;;  %v226_v25 = vld [vmem:[%s910_s4 + $0x20] sm:$0xff] }
  0x11   :  { %560 = vmatmul.mubr.msk.f32.gmra.mrb[2].mxu0 %vm82_vm4, %v30_v17  ;;  %v33_v26 = vld [vmem:[%s907_s1 + $0x20] sm:$0xff]  ;;  %v227_v27 = vld [vmem:[%s910_s4 + $0x28] sm:$0xff]  ;;  %v228_v28 = vld [vmem:[%s910_s4 + $0x30] sm:$0xff] }
  0x12   :  { %562 = vmatprep.mubr.msk.f32.mxu0 %vm691_vm1, %v692_v7  ;;  %v34_v29 = vld [vmem:[%s907_s1 + $0x28] sm:$0xff]  ;;  %v394_v30 = vld [vmem:[#allocation2] sm:$0x1]  ;;  %v35_v31 = vld [vmem:[%s907_s1 + $0x30] sm:$0xff] }
  0x13   :  { %v215_v8 = vld [vmem:[%s909_s3] sm:$0xff]  ;;  %v216_v9 = vld [vmem:[%s909_s3 + $0x8] sm:$0xff]  ;;  %v217_v10 = vld [vmem:[%s909_s3 + $0x10] sm:$0xff] }
  0x14   :  { %79 = vperm.xlu0 %660, %v46_v18   ;;  %231 = vperm.xlu1 %661, %v222_v19   ;;  %v218_v11 = vld [vmem:[%s909_s3 + $0x18] sm:$0xff]  ;;  %v219_v12 = vld [vmem:[%s909_s3 + $0x20] sm:$0xff]  ;;  %v220_v13 = vld [vmem:[%s909_s3 + $0x28] sm:$0xff] }
  0x15   :  { %563 = vmatmul.mubr.msk.f32.gmra.mrb[4].mxu0 %vm82_vm4, %v31_v20  ;;  %v221_v14 = vld [vmem:[%s909_s3 + $0x30] sm:$0xff] }
  0x16   :  { %565 = vmatprep.mubr.msk.f32.mxu0 %vm691_vm1, %v692_v7 }
  0x18   :  { %236 = vperm.xlu0 %660, %v223_v21   ;;  %241 = vperm.xlu1 %661, %v224_v22  }
  0x19   :  { %566 = vmatmul.mubr.msk.f32.gmra.mrb[6].mxu0 %vm82_vm4, %v32_v23 }
  0x1a   :  { %568 = vmatprep.mubr.msk.f32.mxu0 %vm691_vm1, %v692_v7 }
  0x1c   :  { %246 = vperm.xlu0 %660, %v225_v24   ;;  %251 = vperm.xlu1 %661, %v226_v25  }
  0x1d   :  { %569 = vmatmul.mubr.msk.f32.gmra.mrb[8].mxu0 %vm82_vm4, %v33_v26 }
  0x1e   :  { %571 = vmatprep.mubr.msk.f32.mxu0 %vm691_vm1, %v692_v7 }
  0x20   :  { %256 = vperm.xlu0 %660, %v227_v27   ;;  %261 = vperm.xlu1 %661, %v228_v28  }
  0x21   :  { %572 = vmatmul.mubr.msk.f32.gmra.mrb[10].mxu0 %vm82_vm4, %v34_v29 }
  0x22   :  { %574 = vmatprep.mubr.msk.f32.mxu0 %vm691_vm1, %v692_v7 }
  0x24   :  { %397 = vperm.xlu0 %660, %v394_v30  }
  0x25   :  { %575 = vmatmul.mubr.msk.f32.gmra.mrb[12].mxu0 %vm82_vm4, %v35_v31 }
  0x26   :  { %626 = vmatprep.mubr.msk.f32.mxu0 %vm691_vm1, %v692_v7 }
  0x87   :  { %v50_v32 = vpop.permute.xlu0 %49  ;;  %v60_v40 = vpop.permute.xlu1 %59 }
  0x8b   :  { %v55_v36 = vpop.permute.xlu0 %54  ;;  %v65_v47 = vpop.permute.xlu1 %64 }
  0x8f   :  { %v70_v56 = vpop.permute.xlu0 %69  ;;  %v75_v58 = vpop.permute.xlu1 %74 }
  0x93   :  { %v80_v0 = vpop.permute.xlu0 %79  ;;  %v232_v17 = vpop.permute.xlu1 %231 }
  0x97   :  { %v237_v19 = vpop.permute.xlu0 %236  ;;  %v242_v28 = vpop.permute.xlu1 %241 }
  0x9b   :  { %v247_v30 = vpop.permute.xlu0 %246 }
  0xe0   :  { %v174_v33 = vpop.f32.mrb[0].mxu0 }
  0xe1   :  { %v558_v34 = vpop.f32.mrb[1].mxu0  ;;  %v175_v35 = vadd.f32 %v174_v33, %v50_v32 }
  0xe3   :  { %v208_v41 = vmax.f32 %v175_v35, 0.0 }
  0xe4   :  { %v179_v37 = vpop.f32.mrb[2].mxu0 }
  0xe5   :  { %v180_v38 = vadd.f32 %v179_v37, %v55_v36  ;;  %v561_v39 = vpop.f32.mrb[3].mxu0 }
  0xe6   :  { %v252_v39 = vpop.permute.xlu1 %251 }
  0xe7   :  { %v209_v42 = vmax.f32 %v180_v38, 0.0 }
  0xe8   :  { %v184_v43 = vpop.f32.mrb[4].mxu0 }
  0xe9   :  { %v564_v44 = vpop.f32.mrb[5].mxu0  ;;  %v637_v45 = vpack.c.bf16 %v209_v42, %v208_v41  ;;  %v185_v46 = vadd.f32 %v184_v43, %v60_v40  ;;  %v257_v41 = vpop.permute.xlu0 %256 }
  0xeb   :  { %638 = vmatpush3.bf16.msra.mxu1 %v637_v45  ;;  %v210_v51 = vmax.f32 %v185_v46, 0.0 }
  0xec   :  { %v189_v48 = vpop.f32.mrb[6].mxu0  ;;  %639 = vmatprep.subr.bf16.mxu1 %v690_v4 }
  0xed   :  { %v190_v49 = vadd.f32 %v189_v48, %v65_v47  ;;  %v567_v50 = vpop.f32.mrb[7].mxu0  ;;  %v262_v47 = vpop.permute.xlu1 %261 }
  0xef   :  { %v211_v52 = vmax.f32 %v190_v49, 0.0 }
  0xf0   :  { %v194_v53 = vpop.f32.mrb[8].mxu0 }
  0xf1   :  { %v640_v54 = vpack.c.bf16 %v211_v52, %v210_v51  ;;  %v570_v55 = vpop.f32.mrb[9].mxu0  ;;  %v195_v57 = vadd.f32 %v194_v53, %v70_v56  ;;  %v393_v53 = vld [vmem:[%s911_s5] sm:$0x1]  ;;  %v398_v56 = vpop.permute.xlu0 %397  ;;  %s666_s5 = scalar_lea.vmem %s491_s13, 16 }
  0xf2   :  { %p667_p0 = scmp.ne.s32.totalorder %s491_s13, %s666_s5  ;;  %p672_p2 = scmp.lt.s32.totalorder %s670_s14, %s666_s5 }
  0xf3   :  { %641 = vmatpush3.bf16.msra.mxu1 %v640_v54  ;;  %v212_v62 = vmax.f32 %v195_v57, 0.0 }
  0xf4   :  { %v199_v59 = vpop.f32.mrb[10].mxu0  ;;  %642 = vmatprep.subr.bf16.mxu1 %v690_v4  ;;  %p673_p3 = por %p672_p2, %p671_p1 }
  0xf5   :  { %v200_v60 = vadd.f32 %v199_v59, %v75_v58  ;;  %v573_v61 = vpop.f32.mrb[11].mxu0 }
  0xf6   :  { %p674_p4 = pnand %p673_p3, %p667_p0 }
  0xf7   :  { %v213_v63 = vmax.f32 %v200_v60, 0.0 }
  0xf8   :  { %v204_v1 = vpop.f32.mrb[12].mxu0 }
  0xf9   :  { %v643_v2 = vpack.c.bf16 %v213_v63, %v212_v62  ;;  %v205_v3 = vadd.f32 %v204_v1, %v80_v0  ;;  %v576_v5 = vpop.f32.mrb[13].mxu0 }
  0xfb   :  { %644 = vmatpush3.bf16.msra.mxu1 %v643_v2  ;;  %v214_v6 = vmax.f32 %v205_v3, 0.0 }
  0xfc   :  { %589 = vmatprep.subr.mxu1 %v692_v7 }
  0xff   :  { %590 = vmatpush3.msra.mxu1 %v214_v6 }
 0x100   :  { %592 = vmatmul.mubr.msk.f32.vlgmr.msra.gmra.mrb[0].mxu1 %vm264_vm5, %v215_v8 }
 0x101   :  { %594 = vmatprep.mubr.msk.f32.mxu1 %vm691_vm1, %v692_v7 }
 0x104   :  { %595 = vmatmul.mubr.msk.f32.gmra.mrb[2].mxu1 %vm264_vm5, %v216_v9 }
 0x105   :  { %597 = vmatprep.mubr.msk.f32.mxu1 %vm691_vm1, %v692_v7 }
 0x108   :  { %598 = vmatmul.mubr.msk.f32.gmra.mrb[4].mxu1 %vm264_vm5, %v217_v10 }
 0x109   :  { %600 = vmatprep.mubr.msk.f32.mxu1 %vm691_vm1, %v692_v7 }
 0x10c   :  { %601 = vmatmul.mubr.msk.f32.gmra.mrb[6].mxu1 %vm264_vm5, %v218_v11 }
 0x10d   :  { %603 = vmatprep.mubr.msk.f32.mxu1 %vm691_vm1, %v692_v7 }
 0x110   :  { %604 = vmatmul.mubr.msk.f32.gmra.mrb[8].mxu1 %vm264_vm5, %v219_v12 }
 0x111   :  { %606 = vmatprep.mubr.msk.f32.mxu1 %vm691_vm1, %v692_v7 }
 0x114   :  { %607 = vmatmul.mubr.msk.f32.gmra.mrb[10].mxu1 %vm264_vm5, %v220_v13 }
 0x115   :  { %609 = vmatprep.mubr.msk.f32.mxu1 %vm691_vm1, %v692_v7 }
 0x118   :  { %610 = vmatmul.mubr.msk.f32.gmra.mrb[12].mxu1 %vm264_vm5, %v221_v14 }
 0x1d3   :  { %v352_v15 = vpop.f32.mrb[0].mxu1 }
 0x1d4   :  { %v593_v16 = vpop.f32.mrb[1].mxu1  ;;  %v353_v18 = vadd.f32 %v352_v15, %v232_v17 }
 0x1d6   :  { %v386_v23 = vmax.f32 %v353_v18, 0.0 }
 0x1d7   :  { %v357_v20 = vpop.f32.mrb[2].mxu1 }
 0x1d8   :  { %v358_v21 = vadd.f32 %v357_v20, %v237_v19  ;;  %v596_v22 = vpop.f32.mrb[3].mxu1 }
 0x1da   :  { %v387_v24 = vmax.f32 %v358_v21, 0.0 }
 0x1db   :  { %v362_v25 = vpop.f32.mrb[4].mxu1 }
 0x1dc   :  { %v646_v26 = vpack.c.bf16 %v387_v24, %v386_v23  ;;  %v599_v27 = vpop.f32.mrb[5].mxu1  ;;  %v363_v29 = vadd.f32 %v362_v25, %v242_v28 }
 0x1de   :  { %647 = vmatpush3.bf16.msra.mxu0 %v646_v26  ;;  %v388_v34 = vmax.f32 %v363_v29, 0.0 }
 0x1df   :  { %v367_v31 = vpop.f32.mrb[6].mxu1  ;;  %648 = vmatprep.subr.bf16.mxu0 %v690_v4 }
 0x1e0   :  { %v368_v32 = vadd.f32 %v367_v31, %v247_v30  ;;  %v602_v33 = vpop.f32.mrb[7].mxu1 }
 0x1e2   :  { %v389_v35 = vmax.f32 %v368_v32, 0.0 }
 0x1e3   :  { %v372_v36 = vpop.f32.mrb[8].mxu1 }
 0x1e4   :  { %v649_v37 = vpack.c.bf16 %v389_v35, %v388_v34  ;;  %v605_v38 = vpop.f32.mrb[9].mxu1  ;;  %v373_v40 = vadd.f32 %v372_v36, %v252_v39 }
 0x1e6   :  { %650 = vmatpush3.bf16.msra.mxu0 %v649_v37  ;;  %v390_v45 = vmax.f32 %v373_v40, 0.0 }
 0x1e7   :  { %v377_v42 = vpop.f32.mrb[10].mxu1  ;;  %651 = vmatprep.subr.bf16.mxu0 %v690_v4  ;;  %v400_v4 = vlaneseq }
 0x1e8   :  { %v378_v43 = vadd.f32 %v377_v42, %v257_v41  ;;  %v608_v44 = vpop.f32.mrb[11].mxu1 }
 0x1e9   :  { %v401_v54 = vshrl.u32 %v400_v4, 7 }
 0x1ea   :  { %v391_v46 = vmax.f32 %v378_v43, 0.0 }
 0x1eb   :  { %v382_v48 = vpop.f32.mrb[12].mxu1  ;;  %v402_v55 = vsub.s32 0, %v401_v54 }
 0x1ec   :  { %v652_v49 = vpack.c.bf16 %v391_v46, %v390_v45  ;;  %v383_v50 = vadd.f32 %v382_v48, %v262_v47  ;;  %v611_v51 = vpop.f32.mrb[13].mxu1 }
 0x1ed   :  { %v403_v57 = vrot.slane %v398_v56, %v402_v55 }
 0x1ee   :  { %653 = vmatpush3.bf16.msra.mxu0 %v652_v49  ;;  %v392_v52 = vmax.f32 %v383_v50, 0.0 }
 0x1ef   :  { %624 = vmatprep.subr.mxu0 %v692_v7 }
 0x1f2   :  { %625 = vmatpush3.msra.mxu0 %v392_v52 }
 0x1f3   :  { %627 = vmatmul.mubr.msk.f32.vlgmr.msra.gmra.mrb[14].mxu0 %vm264_vm5, %v393_v53 }
 0x2c6   :  { %v473_v58 = vpop.f32.mrb[14].mxu0 }
 0x2c7   :  { %v474_v59 = vadd.f32 %v473_v58, %v403_v57  ;;  %v628_v60 = vpop.f32.mrb[15].mxu0 }
 0x2c9   :  { %v514_v61 = vmul.f32 -1.442695, %v474_v59 }
 0x2cb   :  { %662 = vpow2.f32 %v514_v61 }
 0x2d5   :  { %v663_v62 = vpop.eup %662 }
 0x2d6   :  { %v480_v7 = vadd.f32 1.0, %v663_v62 }
 0x2d8   :  { %664 = vrcp.f32 %v480_v7 }
 0x2e2   :  { %v665_v63 = vpop.eup %664 }
 0x2e3   :  { %483 = vst [vmem:[#allocation3] sm:$0x1] %v665_v63 }
 0x2e4   :  { %677 = shalt.err (!%p674_p4)
}
 0x2e5   :  { %s678_s17 = scalar_lea.hbm %s913_s7, 16 }
 0x2e6   :  { %p679_p5 = scmp.ne.s32.totalorder %s913_s7, %s678_s17  ;;  %p682_p6 = scmp.lt.u32.totalorder %s678_s17, %s913_s7 }
 0x2e8   :  { %p684_p7 = pnand %p682_p6, %p679_p5 }
 0x2ea   :  { %687 = shalt.err (!%p684_p7)
}
 0x2eb   :  { %493 = dma.vmem_to_hbm [thread:$0]  %s491_s13, 16, %s913_s7, [#allocation4]  }
 0x2ec   :  { %688 = dma.done.wait [#allocation4], 16  }
 0x2ed   :  { %689 = vsyncadd [#allocation4], 4294967280 }
 0x2ee   :  { %497 = vsyncpa [#allocation4], 1 }

</bundles_post_ra>
